<compile_context>
chip_gen: v5e
topology: v5e:2x2
jax: 0.10.0
libtpu: 0.0.40
codegen_flags: <defaults>
</compile_context>

<pallas_src>
import jax
import jax.numpy as jnp
from jax import lax
from jax.experimental import pallas as pl
from jax.experimental.pallas import tpu as pltpu


def _cdiv(a, b):
    return (a + b - 1) // b


def _physical_vmem_bytes(default=64 << 20):
    """Best-effort physical VMEM size; conservative 64 MiB (v7x) fallback."""
    try:
        info = pltpu.get_tpu_info()
    except Exception:
        return default
    for name in ("vmem_capacity_bytes", "vmem_size_bytes", "vmem_bytes"):
        v = getattr(info, name, None)
        if isinstance(v, int) and v > 0:
            return v
    return default


def _choose_cls_tile(n_cls, L, n_suf, ctx_dim, itemsize, budget_bytes):
    # Per-class resident bytes (double-buffered): output block (2*L rows) +
    # suffix block (2*n_suf rows) + prefix block (2 rows).
    per_cls = ctx_dim * itemsize * (2 * L + 2 * n_suf + 2)
    max_tile = max(1, int(budget_bytes // per_cls))
    if n_cls >= 2:
        # Keep at least 2 class tiles so the "parallel" class axis can shard across both
        # TensorCores on v7x (near-free on single-core parts).
        max_tile = min(max_tile, _cdiv(n_cls, 2))
    max_tile = min(max_tile, n_cls)
    num_tiles = _cdiv(n_cls, max_tile)
    # Balance tile sizes across tiles -> minimal wasted work in the boundary tile.
    return _cdiv(n_cls, num_tiles)


def _make_kernel(n_ctx, cls_tile, unroll):
    def kernel(imf_ref, w1_ref, b1_ref, w2_ref, b2_ref, ctx_ref,
               pre_ref, suf_ref, out_ref, ctxs_ref):
        # imf: (B, vis_dim)   w1: (vis_dim, hid)   b1: (1, hid)
        # w2: (hid, ctx_dim)  b2: (1, ctx_dim)     ctx: (n_ctx, ctx_dim)
        # pre: (cls_tile, 1, ctx_dim)              suf: (cls_tile, n_suf, ctx_dim)
        # out: (cls_tile, L, ctx_dim)  (leading batch dim squeezed)
        # ctxs scratch: (B, n_ctx, ctx_dim), persistent across grid steps (per core).
        b = pl.program_id(1)

        # Meta-net + ctx shift, recomputed once per class tile (batch is the inner axis).
        # The matmuls are tiny (K = vis_dim//16), so recompute cost is negligible and the
        # guard stays correct when the class axis is split across TensorCores.
        @pl.when(b == 0)
        def _():
            h = jnp.dot(imf_ref[...], w1_ref[...],
                        preferred_element_type=jnp.float32) + b1_ref[...]
            h = jnp.maximum(h, 0.0)
            bias = jnp.dot(h, w2_ref[...],
                           preferred_element_type=jnp.float32) + b2_ref[...]
            ctxs = ctx_ref[...].astype(jnp.float32)[None, :, :] + bias[:, None, :]
            ctxs_ref[...] = ctxs.astype(ctxs_ref.dtype)

        # Direct dense stores into the output block (no template scratch / VMEM copy).
        out_ref[:, 0:1, :] = pre_ref[...].astype(out_ref.dtype)
        out_ref[:, 1 + n_ctx:, :] = suf_ref[...].astype(out_ref.dtype)

        # ctx rows for this batch element, read once from the resident scratch.
        ctx_b = ctxs_ref[b]  # (n_ctx, ctx_dim)

        def _write(c, carry):
            out_ref[c, pl.ds(1, n_ctx), :] = ctx_b
            return carry

        lax.fori_loop(0, cls_tile, _write, 0, unroll=unroll)

    return kernel


def prompt_learner_forward(im_features, w1, b1, w2, b2, ctx,
                           token_prefix, token_suffix, *, cls_tile=None):
    B, vis_dim = im_features.shape
    n_ctx, ctx_dim = ctx.shape
    n_cls = token_prefix.shape[0]
    n_suf = token_suffix.shape[1]
    L = 1 + n_ctx + n_suf
    hidden = w1.shape[1]
    out_dtype = token_prefix.dtype          # prompts follow the token-embedding dtype
    itemsize = jnp.dtype(out_dtype).itemsize

    # Generation-aware VMEM budgeting (v5e/v6e: 128 MiB physical, v7x: 64 MiB per core).
    phys_vmem = _physical_vmem_bytes()
    budget = (phys_vmem * 3) // 4           # class-tile double buffers
    vmem_limit = (phys_vmem * 7) // 8       # leave headroom for residents + internals

    if cls_tile is None:
        cls_tile = _choose_cls_tile(n_cls, L, n_suf, ctx_dim, itemsize, budget)
    cls_tile = max(1, min(cls_tile, n_cls))
    num_tiles = _cdiv(n_cls, cls_tile)      # boundary tile handled by partial-block masking

    b1_2d = b1.reshape(1, hidden)
    b2_2d = b2.reshape(1, ctx_dim)

    # Bounded unroll for the per-class ctx-row writes (avoid huge-instruction-stream full
    # unroll at realistic class-tile sizes).
    if cls_tile <= 8:
        unroll = cls_tile
    else:
        unroll = max(u for u in (1, 2, 4, 8) if cls_tile % u == 0)

    kernel = _make_kernel(n_ctx, cls_tile, unroll)

    cost = pl.CostEstimate(
        flops=num_tiles * (2 * B * vis_dim * hidden + 2 * B * hidden * ctx_dim
                           + B * n_ctx * ctx_dim),
        transcendentals=0,
        bytes_accessed=itemsize * (B * n_cls * L * ctx_dim            # output writeback
                                   + n_cls * (1 + n_suf) * ctx_dim)   # prefix + suffix reads
                       + 4 * (B * vis_dim + vis_dim * hidden + hidden * ctx_dim
                              + (n_ctx + 2) * ctx_dim + hidden),
    )

    return pl.pallas_call(
        kernel,
        out_shape=jax.ShapeDtypeStruct((B, n_cls, L, ctx_dim), out_dtype),
        grid_spec=pltpu.PrefetchScalarGridSpec(
            num_scalar_prefetch=0,
            grid=(num_tiles, B),   # class tiles outer ("parallel"), batch inner ("arbitrary")
            in_specs=[
                pl.BlockSpec((B, vis_dim),               lambda ci, b: (0, 0)),
                pl.BlockSpec((vis_dim, hidden),          lambda ci, b: (0, 0)),
                pl.BlockSpec((1, hidden),                lambda ci, b: (0, 0)),
                pl.BlockSpec((hidden, ctx_dim),          lambda ci, b: (0, 0)),
                pl.BlockSpec((1, ctx_dim),               lambda ci, b: (0, 0)),
                pl.BlockSpec((n_ctx, ctx_dim),           lambda ci, b: (0, 0)),
                pl.BlockSpec((cls_tile, 1, ctx_dim),     lambda ci, b: (ci, 0, 0)),
                pl.BlockSpec((cls_tile, n_suf, ctx_dim), lambda ci, b: (ci, 0, 0)),
            ],
            out_specs=pl.BlockSpec((None, cls_tile, L, ctx_dim),
                                   lambda ci, b: (b, ci, 0, 0)),
            scratch_shapes=[pltpu.VMEM((B, n_ctx, ctx_dim), out_dtype)],
        ),
        compiler_params=pltpu.CompilerParams(
            dimension_semantics=("parallel", "arbitrary"),
            vmem_limit_bytes=int(vmem_limit)),
        cost_estimate=cost,
    )(im_features, w1, b1_2d, w2, b2_2d, ctx, token_prefix, token_suffix)


# ----------------------------------- reference --------------------------------------- #
def reference_forward(im_features, w1, b1, w2, b2, ctx, token_prefix, token_suffix):
    h = jnp.maximum(im_features @ w1 + b1, 0.0)
    bias = h @ w2 + b2                                 # (B, ctx_dim)
    ctx_shifted = ctx[None, :, :] + bias[:, None, :]   # (B, n_ctx, ctx_dim)
    B = im_features.shape[0]
    n_cls = token_prefix.shape[0]
    prompts = []
    for i in range(B):
        ctx_i = jnp.broadcast_to(ctx_shifted[i][None], (n_cls,) + ctx_shifted[i].shape)
        prompts.append(jnp.concatenate([token_prefix, ctx_i, token_suffix], axis=1))
    return jnp.stack(prompts)


if __name__ == "__main__":
    # Small, module-consistent shapes:
    #   vis_dim=128 (meta_net hidden = vis_dim//16 = 8), ctx_dim=128, n_ctx=4,
    #   n_cls=7 (prime -> exercises the uneven boundary class tile), L=16 -> suffix 11, B=2.
    B, vis_dim, ctx_dim, n_ctx, n_cls, L = 2, 128, 128, 4, 7, 16
    hidden = vis_dim // 16
    n_suf = L - 1 - n_ctx
    dtype = jnp.float32

    key = jax.random.PRNGKey(0)
    k = jax.random.split(key, 8)
    # Deterministic synthetic parameters (shapes follow PromptLearner.__init__):
    ctx_param = 0.02 * jax.random.normal(k[0], (n_ctx, ctx_dim), dtype)   # nn.init.normal_(std=0.02)
    w1 = 0.05 * jax.random.normal(k[1], (vis_dim, hidden), dtype)         # meta_net.linear1
    b1 = 0.01 * jax.random.normal(k[2], (hidden,), dtype)
    w2 = 0.05 * jax.random.normal(k[3], (hidden, ctx_dim), dtype)         # meta_net.linear2
    b2 = 0.01 * jax.random.normal(k[4], (ctx_dim,), dtype)
    # TODO(synk): token_prefix/token_suffix come from CLIP token_embedding of tokenized
    # class prompts; here they are deterministic random buffers of the right shapes.
    token_prefix = jax.random.normal(k[5], (n_cls, 1, ctx_dim), dtype)
    token_suffix = jax.random.normal(k[6], (n_cls, n_suf, ctx_dim), dtype)
    im_features = jax.random.normal(k[7], (B, vis_dim), dtype)

    out = prompt_learner_forward(im_features, w1, b1, w2, b2, ctx_param,
                                 token_prefix, token_suffix)
    out = jax.block_until_ready(out)

    ref = reference_forward(im_features, w1, b1, w2, b2, ctx_param,
                            token_prefix, token_suffix)
    assert out.shape == (B, n_cls, L, ctx_dim), out.shape
    assert jnp.allclose(out, ref, atol=1e-5, rtol=1e-5), "mismatch vs reference"
    print("KERNEL_OK")
</pallas_src>

<mosaic_0001>
module attributes {stable_mosaic.version = 11 : i64} {
  func.func @kernel(%arg0: i32, %arg1: i32, %arg2: memref<2x128xf32, #tpu.memory_space<vmem>>, %arg3: memref<128x8xf32, #tpu.memory_space<vmem>>, %arg4: memref<1x8xf32, #tpu.memory_space<vmem>>, %arg5: memref<8x128xf32, #tpu.memory_space<vmem>>, %arg6: memref<1x128xf32, #tpu.memory_space<vmem>>, %arg7: memref<4x128xf32, #tpu.memory_space<vmem>>, %arg8: memref<4x1x128xf32, #tpu.memory_space<vmem>>, %arg9: memref<4x11x128xf32, #tpu.memory_space<vmem>>, %arg10: memref<1x4x16x128xf32, #tpu.memory_space<vmem>>, %arg11: memref<2x4x128xf32, #tpu.memory_space<vmem>>) attributes {dimension_semantics = [#tpu.dimension_semantics<parallel>, #tpu.dimension_semantics<arbitrary>], iteration_bounds = array<i64: 2, 2>, scalar_prefetch = 0 : i64, scratch_operands = 1 : i64, tpu.core_type = #tpu.core_type<tc>, window_params = [{pipeline_mode = #tpu.pipeline_mode<synchronous>, transform_indices = @transform_0, window_bounds = array<i64: 2, 128>}, {pipeline_mode = #tpu.pipeline_mode<synchronous>, transform_indices = @transform_1, window_bounds = array<i64: 128, 8>}, {pipeline_mode = #tpu.pipeline_mode<synchronous>, transform_indices = @transform_2, window_bounds = array<i64: 1, 8>}, {pipeline_mode = #tpu.pipeline_mode<synchronous>, transform_indices = @transform_3, window_bounds = array<i64: 8, 128>}, {pipeline_mode = #tpu.pipeline_mode<synchronous>, transform_indices = @transform_4, window_bounds = array<i64: 1, 128>}, {pipeline_mode = #tpu.pipeline_mode<synchronous>, transform_indices = @transform_5, window_bounds = array<i64: 4, 128>}, {transform_indices = @transform_6, window_bounds = array<i64: 4, 1, 128>}, {transform_indices = @transform_7, window_bounds = array<i64: 4, 11, 128>}, {transform_indices = @transform_8, window_bounds = array<i64: 1, 4, 16, 128>}]} {
    %c0_i32 = arith.constant 0 : i32
    %0 = arith.cmpi eq, %arg1, %c0_i32 : i32
    %1 = arith.extui %0 : i1 to i32
    %c0_i32_0 = arith.constant 0 : i32
    %2 = arith.cmpi ne, %1, %c0_i32_0 : i32
    scf.if %2 {
      %c0_27 = arith.constant 0 : index
      %c0_28 = arith.constant 0 : index
      %30 = vector.load %arg2[%c0_27, %c0_28] : memref<2x128xf32, #tpu.memory_space<vmem>>, vector<2x128xf32>
      %c0_29 = arith.constant 0 : index
      %c0_30 = arith.constant 0 : index
      %31 = vector.load %arg3[%c0_29, %c0_30] : memref<128x8xf32, #tpu.memory_space<vmem>>, vector<128x8xf32>
      %cst = arith.constant dense<0.000000e+00> : vector<2x8xf32>
      %32 = tpu.matmul %30, %31, %cst {dimension_numbers = #tpu.dot_dimension_numbers<[1], [0], [0], [1], [0, 0, 1, 1], [], []>} : vector<2x128xf32>, vector<128x8xf32>, vector<2x8xf32> -> vector<2x8xf32>
      %c0_31 = arith.constant 0 : index
      %c0_32 = arith.constant 0 : index
      %33 = vector.load %arg4[%c0_31, %c0_32] : memref<1x8xf32, #tpu.memory_space<vmem>>, vector<1x8xf32>
      %34 = vector.broadcast %33 : vector<1x8xf32> to vector<2x8xf32>
      %35 = arith.addf %32, %34 : vector<2x8xf32>
      %cst_33 = arith.constant 0.000000e+00 : f32
      %36 = vector.broadcast %cst_33 : f32 to vector<2x8xf32>
      %37 = arith.maximumf %35, %36 : vector<2x8xf32>
      %c0_34 = arith.constant 0 : index
      %c0_35 = arith.constant 0 : index
      %38 = vector.load %arg5[%c0_34, %c0_35] : memref<8x128xf32, #tpu.memory_space<vmem>>, vector<8x128xf32>
      %cst_36 = arith.constant dense<0.000000e+00> : vector<2x128xf32>
      %39 = tpu.matmul %37, %38, %cst_36 {dimension_numbers = #tpu.dot_dimension_numbers<[1], [0], [0], [1], [0, 0, 1, 1], [], []>} : vector<2x8xf32>, vector<8x128xf32>, vector<2x128xf32> -> vector<2x128xf32>
      %c0_37 = arith.constant 0 : index
      %c0_38 = arith.constant 0 : index
      %40 = vector.load %arg6[%c0_37, %c0_38] : memref<1x128xf32, #tpu.memory_space<vmem>>, vector<1x128xf32>
      %41 = vector.broadcast %40 : vector<1x128xf32> to vector<2x128xf32>
      %42 = arith.addf %39, %41 : vector<2x128xf32>
      %c0_39 = arith.constant 0 : index
      %c0_40 = arith.constant 0 : index
      %43 = vector.load %arg7[%c0_39, %c0_40] : memref<4x128xf32, #tpu.memory_space<vmem>>, vector<4x128xf32>
      %44 = vector.shape_cast %43 : vector<4x128xf32> to vector<1x4x128xf32>
      %45 = vector.shape_cast %42 : vector<2x128xf32> to vector<2x1x128xf32>
      %46 = vector.broadcast %44 : vector<1x4x128xf32> to vector<2x4x128xf32>
      %47 = vector.broadcast %45 : vector<2x1x128xf32> to vector<2x4x128xf32>
      %48 = arith.addf %46, %47 : vector<2x4x128xf32>
      %c0_41 = arith.constant 0 : index
      %c0_42 = arith.constant 0 : index
      %c0_43 = arith.constant 0 : index
      %49 = vector.load %arg11[%c0_41, %c0_42, %c0_43] : memref<2x4x128xf32, #tpu.memory_space<vmem>>, vector<2x4x128xf32>
      tpu.vector_store %arg11[%c0_41, %c0_42, %c0_43], %48 {strides = array<i32>} : memref<2x4x128xf32, #tpu.memory_space<vmem>>, vector<2x4x128xf32>,
    } else {
    }
    %c0 = arith.constant 0 : index
    %c0_1 = arith.constant 0 : index
    %c0_2 = arith.constant 0 : index
    %3 = vector.load %arg8[%c0, %c0_1, %c0_2] : memref<4x1x128xf32, #tpu.memory_space<vmem>>, vector<4x1x128xf32>
    %c0_3 = arith.constant 0 : index
    %c0_4 = arith.constant 0 : index
    %c0_5 = arith.constant 0 : index
    %c0_6 = arith.constant 0 : index
    %4 = vector.load %arg10[%c0_3, %c0_4, %c0_5, %c0_6] : memref<1x4x16x128xf32, #tpu.memory_space<vmem>>, vector<1x4x1x128xf32>
    %5 = vector.shape_cast %4 : vector<1x4x1x128xf32> to vector<4x1x128xf32>
    %6 = vector.shape_cast %3 : vector<4x1x128xf32> to vector<1x4x1x128xf32>
    tpu.vector_store %arg10[%c0_3, %c0_4, %c0_5, %c0_6], %6 {strides = array<i32>} : memref<1x4x16x128xf32, #tpu.memory_space<vmem>>, vector<1x4x1x128xf32>,
    %c0_7 = arith.constant 0 : index
    %c0_8 = arith.constant 0 : index
    %c0_9 = arith.constant 0 : index
    %7 = vector.load %arg9[%c0_7, %c0_8, %c0_9] : memref<4x11x128xf32, #tpu.memory_space<vmem>>, vector<4x11x128xf32>
    %c0_10 = arith.constant 0 : index
    %c0_11 = arith.constant 0 : index
    %c5 = arith.constant 5 : index
    %c0_12 = arith.constant 0 : index
    %8 = vector.load %arg10[%c0_10, %c0_11, %c5, %c0_12] : memref<1x4x16x128xf32, #tpu.memory_space<vmem>>, vector<1x4x11x128xf32>
    %9 = vector.shape_cast %8 : vector<1x4x11x128xf32> to vector<4x11x128xf32>
    %10 = vector.shape_cast %7 : vector<4x11x128xf32> to vector<1x4x11x128xf32>
    tpu.vector_store %arg10[%c0_10, %c0_11, %c5, %c0_12], %10 {strides = array<i32>} : memref<1x4x16x128xf32, #tpu.memory_space<vmem>>, vector<1x4x11x128xf32>,
    %11 = arith.index_cast %arg1 : i32 to index
    %c0_13 = arith.constant 0 : index
    %c0_14 = arith.constant 0 : index
    %12 = vector.load %arg11[%11, %c0_13, %c0_14] : memref<2x4x128xf32, #tpu.memory_space<vmem>>, vector<1x4x128xf32>
    %13 = vector.shape_cast %12 : vector<1x4x128xf32> to vector<4x128xf32>
    %c0_i32_15 = arith.constant 0 : i32
    %c0_16 = arith.constant 0 : index
    %14 = arith.index_cast %c0_i32_15 : i32 to index
    %c1 = arith.constant 1 : index
    %c0_17 = arith.constant 0 : index
    %15 = vector.load %arg10[%c0_16, %14, %c1, %c0_17] : memref<1x4x16x128xf32, #tpu.memory_space<vmem>>, vector<1x1x4x128xf32>
    %16 = vector.shape_cast %15 : vector<1x1x4x128xf32> to vector<4x128xf32>
    %17 = vector.shape_cast %13 : vector<4x128xf32> to vector<1x1x4x128xf32>
    tpu.vector_store %arg10[%c0_16, %14, %c1, %c0_17], %17 {strides = array<i32>} : memref<1x4x16x128xf32, #tpu.memory_space<vmem>>, vector<1x1x4x128xf32>,
    %c1_i32 = arith.constant 1 : i32
    %c0_18 = arith.constant 0 : index
    %18 = arith.index_cast %c1_i32 : i32 to index
    %c1_19 = arith.constant 1 : index
    %c0_20 = arith.constant 0 : index
    %19 = vector.load %arg10[%c0_18, %18, %c1_19, %c0_20] : memref<1x4x16x128xf32, #tpu.memory_space<vmem>>, vector<1x1x4x128xf32>
    %20 = vector.shape_cast %19 : vector<1x1x4x128xf32> to vector<4x128xf32>
    %21 = vector.shape_cast %13 : vector<4x128xf32> to vector<1x1x4x128xf32>
    tpu.vector_store %arg10[%c0_18, %18, %c1_19, %c0_20], %21 {strides = array<i32>} : memref<1x4x16x128xf32, #tpu.memory_space<vmem>>, vector<1x1x4x128xf32>,
    %c2_i32 = arith.constant 2 : i32
    %c0_21 = arith.constant 0 : index
    %22 = arith.index_cast %c2_i32 : i32 to index
    %c1_22 = arith.constant 1 : index
    %c0_23 = arith.constant 0 : index
    %23 = vector.load %arg10[%c0_21, %22, %c1_22, %c0_23] : memref<1x4x16x128xf32, #tpu.memory_space<vmem>>, vector<1x1x4x128xf32>
    %24 = vector.shape_cast %23 : vector<1x1x4x128xf32> to vector<4x128xf32>
    %25 = vector.shape_cast %13 : vector<4x128xf32> to vector<1x1x4x128xf32>
    tpu.vector_store %arg10[%c0_21, %22, %c1_22, %c0_23], %25 {strides = array<i32>} : memref<1x4x16x128xf32, #tpu.memory_space<vmem>>, vector<1x1x4x128xf32>,
    %c3_i32 = arith.constant 3 : i32
    %c0_24 = arith.constant 0 : index
    %26 = arith.index_cast %c3_i32 : i32 to index
    %c1_25 = arith.constant 1 : index
    %c0_26 = arith.constant 0 : index
    %27 = vector.load %arg10[%c0_24, %26, %c1_25, %c0_26] : memref<1x4x16x128xf32, #tpu.memory_space<vmem>>, vector<1x1x4x128xf32>
    %28 = vector.shape_cast %27 : vector<1x1x4x128xf32> to vector<4x128xf32>
    %29 = vector.shape_cast %13 : vector<4x128xf32> to vector<1x1x4x128xf32>
    tpu.vector_store %arg10[%c0_24, %26, %c1_25, %c0_26], %29 {strides = array<i32>} : memref<1x4x16x128xf32, #tpu.memory_space<vmem>>, vector<1x1x4x128xf32>,
    %c4_i32 = arith.constant 4 : i32
    return
  }
  func.func @transform_0(%arg0: i32, %arg1: i32) -> (i32, i32) {
    %c0_i32 = arith.constant 0 : i32
    %c0_i32_0 = arith.constant 0 : i32
    %c0_i32_1 = arith.constant 0 : i32
    return %c0_i32, %c0_i32_0 : i32, i32
  }
  func.func @transform_1(%arg0: i32, %arg1: i32) -> (i32, i32) {
    %c0_i32 = arith.constant 0 : i32
    %c0_i32_0 = arith.constant 0 : i32
    %c0_i32_1 = arith.constant 0 : i32
    return %c0_i32, %c0_i32_0 : i32, i32
  }
  func.func @transform_2(%arg0: i32, %arg1: i32) -> (i32, i32) {
    %c0_i32 = arith.constant 0 : i32
    %c0_i32_0 = arith.constant 0 : i32
    %c0_i32_1 = arith.constant 0 : i32
    return %c0_i32, %c0_i32_0 : i32, i32
  }
  func.func @transform_3(%arg0: i32, %arg1: i32) -> (i32, i32) {
    %c0_i32 = arith.constant 0 : i32
    %c0_i32_0 = arith.constant 0 : i32
    %c0_i32_1 = arith.constant 0 : i32
    return %c0_i32, %c0_i32_0 : i32, i32
  }
  func.func @transform_4(%arg0: i32, %arg1: i32) -> (i32, i32) {
    %c0_i32 = arith.constant 0 : i32
    %c0_i32_0 = arith.constant 0 : i32
    %c0_i32_1 = arith.constant 0 : i32
    return %c0_i32, %c0_i32_0 : i32, i32
  }
  func.func @transform_5(%arg0: i32, %arg1: i32) -> (i32, i32) {
    %c0_i32 = arith.constant 0 : i32
    %c0_i32_0 = arith.constant 0 : i32
    %c0_i32_1 = arith.constant 0 : i32
    return %c0_i32, %c0_i32_0 : i32, i32
  }
  func.func @transform_6(%arg0: i32, %arg1: i32) -> (i32, i32, i32) {
    %c0_i32 = arith.constant 0 : i32
    %c0_i32_0 = arith.constant 0 : i32
    %c0_i32_1 = arith.constant 0 : i32
    return %arg0, %c0_i32, %c0_i32_0 : i32, i32, i32
  }
  func.func @transform_7(%arg0: i32, %arg1: i32) -> (i32, i32, i32) {
    %c0_i32 = arith.constant 0 : i32
    %c0_i32_0 = arith.constant 0 : i32
    %c0_i32_1 = arith.constant 0 : i32
    return %arg0, %c0_i32, %c0_i32_0 : i32, i32, i32
  }
  func.func @transform_8(%arg0: i32, %arg1: i32) -> (i32, i32, i32, i32) {
    %c0_i32 = arith.constant 0 : i32
    %c0_i32_0 = arith.constant 0 : i32
    %c0_i32_1 = arith.constant 0 : i32
    return %arg1, %arg0, %c0_i32, %c0_i32_0 : i32, i32, i32, i32
  }
}

</mosaic_0001>

<bundles_post_ra>
// kernel: tpu_custom_call.1
= control target key start
LH: loop header
LB: loop body
LE: loop exit
PB: predicated region body
PF: predicated region fallthrough
CT: control target
= control target key end

     0   :  { %13 = vsyncpa [#allocation4], 0  ;;  %s1145_s0 = inlined_call_operand.vmem [shape: f32[2,128], index: 0, kind: input, shape index: {}]   ;;  %s1146_s1 = inlined_call_operand.vmem [shape: f32[128,8], index: 1, kind: input, shape index: {}]   ;;  %s1147_s2 = inlined_call_operand.vmem [shape: f32[1,8], index: 2, kind: input, shape index: {}]   ;;  %s1148_s3 = inlined_call_operand.vmem [shape: f32[8,128], index: 3, kind: input, shape index: {}]   ;;  %s1149_s4 = inlined_call_operand.vmem [shape: f32[1,128], index: 4, kind: input, shape index: {}]   ;;  %s1150_s5 = inlined_call_operand.vmem [shape: f32[4,128], index: 5, kind: input, shape index: {}]   ;;  %s1151_s6 = inlined_call_operand.vmem [shape: f32[7,1,128], index: 6, kind: input, shape index: {}]   ;;  %s1152_s7 = inlined_call_operand.vmem [shape: f32[7,11,128], index: 7, kind: input, shape index: {}]   ;;  %s1153_s8 = inlined_call_operand.hbm [shape: f32[2,7,16,128], index: 8, kind: output, shape index: {}]  }
   0x1   :  { %15 = vsyncpa [#allocation4 + $0x1], 0  ;;  %s886_s27 = smov 0   ;;  %s888_s28 = smov 0  }
   0x2   :  { %s890_s29 = smov 0   ;;  %s892_s30 = smov 0  }
   0x3   :  { %s894_s9 = smov 0   ;;  %s896_s10 = smov 0  }
   0x4   :  { %s898_s11 = smov 0   ;;  %s900_s12 = smov 0  }
   0x5 LB: > { %1160 = sst [smem:[#allocation6_spill]] %s816_s29  ;;  %s623_s13 = sadd.s32 4294967295, %s836_s12   ;;  %s836_s12 = sphi %s900_s12, %s21_s12   ;;  %s832_s11 = sphi %s898_s11, %s1175_s11   ;;  %s828_s10 = sphi %s896_s10, %s1174_s10   ;;  %s824_s9 = sphi %s894_s9, %s1173_s9   ;;  %s820_s30 = sphi %s892_s30, %s1172_s30   ;;  %s816_s29 = sphi %s890_s29, %s1171_s29   ;;  %s812_s28 = sphi %s888_s28, %s1177_s28   ;;  %s808_s27 = sphi %s886_s27, %s1176_s27  }
   0x6   : > { %1161 = sst [smem:[#allocation7_spill]] %s828_s10  ;;  %s624_s14 = sadd.s32 4294967294, %s836_s12  }
   0x7   : > { %1162 = sst [smem:[#allocation8_spill]] %s832_s11  ;;  %s30_s15 = sadd.s32 1, %s828_s10 }
   0x8   : > { %p31_p0 = scmp.ge.s32.totalorder %s30_s15, 2  ;;  %s33_s16 = sadd.s32 1, %s832_s11 }
   0x9   : > { %p230_p1 = scmp.ne.s32.totalorder %s816_s29, %s812_s28  ;;  %p231_p2 = scmp.eq.s32.totalorder %s623_s13, 3 }
   0xa   : > { %s1179_s15 = smov (%p31_p0, %s30_s15), 0  ;;  %s1181_s16 = smov (!%p31_p0, %s33_s16), %s832_s11 }
   0xb   : > { %1163 = sst [smem:[#allocation9_spill]] %s1179_s15  ;;  %s215_s17 = ssub.s32 %s828_s10, %s1179_s15 }
   0xc   : > { %p937_p3 = por %p231_p2, %p230_p1  ;;  %p35_p4 = scmp.ge.s32.totalorder %s1181_s16, 2 }
   0xd   : > { %p236_p5 = scmp.ne.s32.totalorder %s812_s28, %s808_s27  ;;  %p237_p6 = scmp.eq.s32.totalorder %s624_s14, 3 }
   0xe   : > { %p627_p7 = scmp.ge.s32.totalorder %s836_s12, 1  ;;  %s1183_s16 = smov (%p35_p4, %s1181_s16), 0 }
   0xf   : > { %1165 = sst [smem:[#allocation10_spill]] %s1183_s16  ;;  %p946_p8 = por %p237_p6, %p236_p5 }
  0x10   : > { %p307_p9 = scmp.lt.s32.totalorder %s836_s12, 5  ;;  %s216_s20 = ssub.s32 %s832_s11, %s1183_s16 }
  0x11   : > { %s220_s21 = sadd.s32 1, %s816_s29  ;;  %s217_s22 = sor.u32 %s216_s20, %s215_s17 }
  0x12   : > { %p308_p10 = pnand %p627_p7, %p307_p9  ;;  %p218_p11 = scmp.eq.s32.totalorder %s217_s22, 0 }
  0x13   : > { %s1158_s24 = sand.u32 (!%p308_p10), 1, %s812_s28   ;;  %s959_s25 = sshll.u32 (!%p308_p10), %s824_s9, 2 }
  0x14   : > { %s955_s23 = scalar_select %p218_p11, %s816_s29, %s220_s21  }
  0x15   : > { %311 = sbr.rel (%p308_p10) target bundleno = 378 (0x17a), region = 52  ;;  %s628_s26 = sshll.u32 (!%p308_p10), %s1158_s24, 6 }
  0x16   : > { %1167 = sst [smem:[#allocation11_spill]] %s955_s23  ;;  %p358_p12 = scmp.lt.s32.totalorder (!%p308_p10), %s959_s25, 6 }
  0x17   : > { %s975_s11 = scalar_lea.vmem (!%p308_p10), [#allocation3], %s628_s26  ;;  %p633_p13 = scmp.ne.s32.totalorder (!%p308_p10), %s820_s30, 0 }
  0x1a   : > { %s359_s13 = scalar_select %p358_p12, %s959_s25, 6 }
  0x1b   : > { %391 = sbr.rel (%p633_p13) target bundleno = 329 (0x149), region = 56 }
  0x1c   : > { %s968_s17 = scalar_lea.vmem %s1151_s6, %s359_s13  ;;  %s651_s20 = sshll.u32 %s359_s13, 4 }
  0x1d   : > { %s973_s15 = scalar_lea.vmem %s1152_s7, %s651_s20 }
  0x20   : > { %v408_v0 = vld [vmem:[%s1146_s1 + $0x78] sm:$0xff]  ;;  %v407_v1 = vld [vmem:[%s1146_s1 + $0x70] sm:$0xff]  ;;  %v406_v2 = vld [vmem:[%s1146_s1 + $0x68] sm:$0xff]  ;;  %vm439_vm0 = vcmask 64512  }
  0x21   : > { %413 = vmatpush.msra.mxu0 %v408_v0  ;;  %v405_v3 = vld [vmem:[%s1146_s1 + $0x60] sm:$0xff]  ;;  %v404_v4 = vld [vmem:[%s1146_s1 + $0x58] sm:$0xff]  ;;  %v403_v5 = vld [vmem:[%s1146_s1 + $0x50] sm:$0xff] }
  0x22   : > { %v402_v6 = vld [vmem:[%s1146_s1 + $0x48] sm:$0xff]  ;;  %v401_v7 = vld [vmem:[%s1146_s1 + $0x40] sm:$0xff]  ;;  %v400_v8 = vld [vmem:[%s1146_s1 + $0x38] sm:$0xff] }
  0x23   : > { %414 = vmatpush.msra.mxu0 %v407_v1  ;;  %v399_v9 = vld [vmem:[%s1146_s1 + $0x30] sm:$0xff]  ;;  %v398_v10 = vld [vmem:[%s1146_s1 + $0x28] sm:$0xff]  ;;  %v397_v11 = vld [vmem:[%s1146_s1 + $0x20] sm:$0xff] }
  0x24   : > { %v396_v12 = vld [vmem:[%s1146_s1 + $0x18] sm:$0xff]  ;;  %v395_v13 = vld [vmem:[%s1146_s1 + $0x10] sm:$0xff]  ;;  %v394_v14 = vld [vmem:[%s1146_s1 + $0x8] sm:$0xff] }
  0x25   : > { %415 = vmatpush.msra.mxu0 %v406_v2  ;;  %v393_v15 = vld [vmem:[%s1146_s1] sm:$0xff] }
  0x26   : > { %v392_v16 = vld [vmem:[%s1145_s0] sm:$0x3] }
  0x27   : > { %416 = vmatpush.msra.mxu0 %v405_v3  ;;  %v434_v17 = vld [vmem:[%s1148_s3] sm:$0xff] }
  0x28   : > { %458 = vmatpush.msra.mxu1 %v434_v17  ;;  %v729_v18 = vld [vmem:[%s1147_s2] ss:$0 sm:$0xff] }
  0x29   : > { %417 = vmatpush.msra.mxu0 %v404_v4  ;;  %v730_v22 = vld [vmem:[%s1149_s4] ss:$0 sm:$0xff] }
  0x2a   : > { %v463_v25 = vld [vmem:[%s1150_s5] sm:$0xf] }
  0x2b   : > { %418 = vmatpush.msra.mxu0 %v403_v5 }
  0x2d   : > { %419 = vmatpush.msra.mxu0 %v402_v6 }
  0x2f   : > { %420 = vmatpush.msra.mxu0 %v401_v7 }
  0x31   : > { %421 = vmatpush.msra.mxu0 %v400_v8 }
  0x33   : > { %422 = vmatpush.msra.mxu0 %v399_v9 }
  0x35   : > { %423 = vmatpush.msra.mxu0 %v398_v10 }
  0x37   : > { %424 = vmatpush.msra.mxu0 %v397_v11 }
  0x39   : > { %425 = vmatpush.msra.mxu0 %v396_v12 }
  0x3b   : > { %426 = vmatpush.msra.mxu0 %v395_v13 }
  0x3d   : > { %427 = vmatpush.msra.mxu0 %v394_v14 }
  0x3f   : > { %428 = vmatpush.msra.mxu0 %v393_v15 }
  0x40   : > { %429 = vmatmul.f32.vlgmr.msra.gmra.mxu0 %v392_v16 }
  0xbd   : > { %v430_v19 = vpop.f32.mrf.mxu0 }
  0xbe   : > { %v431_v20 = vadd.f32 %v729_v18, %v430_v19 }
  0xc0   : > { %v433_v21 = vmax.f32 %v431_v20, 0.0 }
  0xc2   : > { %634 = vmatmul.msk.f32.vlgmr.msra.gmra.mxu1 %vm439_vm0, %v433_v21 }
 0x13f   : > { %v460_v23 = vpop.f32.mrf.mxu1 }
 0x140   : > { %v461_v24 = vadd.f32 %v730_v22, %v460_v23 }
 0x142   : > { %v465_v26 = vrot.slane %v461_v24, 1  ;;  %v466_v27 = vperm.slane %v461_v24, 0 }
 0x144   : > { %v467_v28 = vperm.slane %v465_v26, 0  ;;  %v470_v29 = vadd.f32 %v466_v27, %v463_v25 }
 0x146   : > { %v471_v30 = vadd.f32 %v467_v28, %v463_v25  ;;  %472 = vst [vmem:[#allocation2] sm:$0xf] %v470_v29 }
 0x148   : > { %473 = vst [vmem:[#allocation2 + $0x4] sm:$0xf] %v471_v30 }
 0x149 PF: > { %v474_v31 = vld [vmem:[%s968_s17] sm:$0x1]  ;;  %v475_v32 = vld [vmem:[%s968_s17 + $0x1] sm:$0x1]  ;;  %v476_v33 = vld [vmem:[%s968_s17 + $0x2] sm:$0x1] }
 0x14a   : > { %478 = vst [vmem:[%s975_s11] sm:$0x1] %v474_v31  ;;  %v477_v34 = vld [vmem:[%s968_s17 + $0x3] sm:$0x1]  ;;  %v483_v36 = vld [vmem:[%s973_s15 + $0x8] sm:$0x7]  ;;  %v484_v37 = vld [vmem:[%s973_s15 + $0x10] sm:$0xff] }
 0x14b   : > { %479 = vst [vmem:[%s975_s11 + $0x10] sm:$0x1] %v475_v32  ;;  %v482_v35 = vld [vmem:[%s973_s15] sm:$0xff]  ;;  %s635_s21 = sshll.u32 %s820_s30, 2  ;;  %v485_v38 = vld [vmem:[%s973_s15 + $0x18] sm:$0x7] }
 0x14c   : > { %480 = vst [vmem:[%s975_s11 + $0x20] sm:$0x1] %v476_v33  ;;  %v486_v39 = vld [vmem:[%s973_s15 + $0x20] sm:$0xff]  ;;  %v487_v40 = vld [vmem:[%s973_s15 + $0x28] sm:$0x7]  ;;  %v488_v41 = vld [vmem:[%s973_s15 + $0x30] sm:$0xff] }
 0x14d   : > { %481 = vst [vmem:[%s975_s11 + $0x30] sm:$0x1] %v477_v34  ;;  %v489_v42 = vld [vmem:[%s973_s15 + $0x38] sm:$0x7]  ;;  %s499_s17 = scalar_lea.vmem [#allocation2], %s635_s21  ;;  %s1168_s10 = sand.u32 1, %s812_s28  }
 0x14e   : > { %490 = vst [vmem:[%s975_s11 + $0x5] sm:$0xff] %v482_v35  ;;  %s1072_s24 = scalar_lea.sflag [#allocation4], %s1168_s10  ;;  %s517_s29 = ssub.s32 (%p937_p3), 7, %s959_s25 }
 0x14f   : > { %491 = vst [vmem:[%s975_s11 + $0xd] sm:$0x7] %v483_v36  ;;  %v500_v43 = vld [vmem:[%s499_s17] sm:$0xf]  ;;  %p518_p0 = scmp.lt.s32.totalorder (%p937_p3), %s517_s29, 4 }
 0x150   : > { %492 = vst [vmem:[%s975_s11 + $0x15] sm:$0xff] %v484_v37 }
 0x151   : > { %493 = vst [vmem:[%s975_s11 + $0x1d] sm:$0x7] %v485_v38 }
 0x152   : > { %494 = vst [vmem:[%s975_s11 + $0x25] sm:$0xff] %v486_v39 }
 0x153   : > { %495 = vst [vmem:[%s975_s11 + $0x2d] sm:$0x7] %v487_v40 }
 0x154   : > { %496 = vst [vmem:[%s975_s11 + $0x35] sm:$0xff] %v488_v41 }
 0x155   : > { %497 = vst [vmem:[%s975_s11 + $0x3d] sm:$0x7] %v489_v42  ;;  %515 = sbr.rel (!%p937_p3) target bundleno = 378 (0x17a), region = 60 }
 0x156   : > { %501 = vst [vmem:[%s975_s11 + $0x1] sm:$0xf] %v500_v43 }
 0x157   : > { %636 = vst [vmem:[%s975_s11 + $0x11] sm:$0xf] %v500_v43 }
 0x158   : > { %637 = vst [vmem:[%s975_s11 + $0x21] sm:$0xf] %v500_v43 }
 0x159   : > { %638 = vst [vmem:[%s975_s11 + $0x31] sm:$0xf] %v500_v43 }
 0x15a   : > { %s1185_s29 = smov (!%p518_p0, %s517_s29), 4 }
 0x15b   : > { %s652_s15 = sshll.u32 %s1185_s29, 4 }
 0x15c   : > { %s522_s23 = ssub.s32 64, %s652_s15 }
 0x15d   : > { %s523_s22 = sshll.u32 %s522_s23, 4 }
 0x15e   : > { %524 = vsyncadd %s1072_s24, %s523_s22  ;;  %s653_s16 = sshll.u32 %s824_s9, 3  ;;  %s656_s13 = smul.u32 14, %s820_s30 }
 0x15f   : > { %s533_s18 = sshll.u32 %s975_s11, 4  ;;  %p1084_p1 = scmp.ne.s32.totalorder %s652_s15, 0  ;;  %s1088_s18 = int_to_ptr.vmem [resolvable:$true] %s533_s18 }
 0x160   : > { %s528_s25 = sadd.s32 %s656_s13, %s653_s16  ;;  %s655_s26 = sshll.u32 %s1185_s29, 8 }
 0x161   : > { %s645_s20 = sshll.u32 %s528_s25, 3  ;;  %s731_s30 = sshra.s32 %s1088_s18, 4  ;;  %s732_s30 = int_to_ptr.vmem [resolvable:$true] %s731_s30 }
 0x162   : > { %s530_s10 = scalar_lea.hbm %s1153_s8, %s645_s20  ;;  %s733_s9 = sshrl.u32 %s655_s26, 4 }
 0x163   : > { %s535_s23 = sshll.u32 %s530_s10, 4  ;;  %s738_s11 = scalar_lea.vmem %s732_s30, %s733_s9  ;;  %s1094_s23 = int_to_ptr.hbm [resolvable:$true] %s535_s23 }
 0x164   : > { %p739_p2 = scmp.ne.s32.totalorder %s732_s30, %s738_s11  ;;  %s838_s15 = smov [#allocation3]  }
 0x165   : > { %s742_s22 = scalar_lea.vmem %s838_s15, 128 }
 0x166   : > { %p740_p3 = pnand %p739_p2, %p1084_p1  ;;  %p744_p5 = scmp.lt.s32.totalorder %s742_s22, %s738_s11 }
 0x168   : > { %p741_p4 = pneg %p740_p3 }
 0x16a   : > { %p746_p6 = pnand %p744_p5, %p741_p4 }
 0x16c   : > { %749 = shalt.err (!%p746_p6)
}
 0x16d   : > { %s750_s16 = sshra.s32 %s1094_s23, 4  ;;  %s761_s21 = scalar_lea.hbm %s1153_s8, 224  ;;  %s751_s16 = int_to_ptr.hbm [resolvable:$true] %s750_s16 }
 0x16e   : > { %s757_s13 = scalar_lea.hbm %s751_s16, %s733_s9  ;;  %p762_p11 = scmp.lt.s32.totalorder %s751_s16, %s1153_s8 }
 0x16f   : > { %p758_p7 = scmp.ne.s32.totalorder %s751_s16, %s757_s13  ;;  %p763_p12 = scmp.lt.s32.totalorder %s761_s21, %s757_s13 }
 0x171   : > { %p759_p9 = pnand %p758_p7, %p1084_p1  ;;  %p764_p13 = por %p763_p12, %p762_p11 }
 0x173   : > { %p760_p10 = pneg %p759_p9 }
 0x175   : > { %p765_p0 = pnand %p764_p13, %p760_p10 }
 0x177   : > { %768 = shalt.err (!%p765_p0)
}
 0x178   : > { %s839_s30 = smov 128   ;;  %s840_s9 = smov 8  }
 0x179   : > { %541 = dma.vmem_to_hbm [thread:$0]  (%p1084_p1), %s1088_s18, %s655_s26, %s1094_s23, %s1072_s24, %s839_s30, %s839_s30, %s840_s9  }
 0x17a PF: > { %p662_p2 = scmp.ge.s32.totalorder %s836_s12, 2  ;;  %s550_s11 = sand.u32 1, %s808_s27  }
 0x17b   : > { %s551_s15 = scalar_lea.sflag [#allocation4], %s550_s11 }
 0x17c   : > { %p659_p3 = pnand %p662_p2, %p946_p8 }
 0x17e   : > { %p660_p4 = pneg %p659_p3 }
 0x180   : > { %803 = dma.done.wait (%p660_p4), %s551_s15, 1024  }
 0x181   : > { %805 = vsyncadd (%p660_p4), %s551_s15, 4294966272  ;;  %s21_s12 = sadd.s32 1, %s836_s12   ;;  %s1170_s14 = sld [smem:[#allocation6_spill]] }
 0x182   : > { %p18_p5 = scmp.ge.s32.totalorder %s21_s12, 6   ;;  %s1171_s29 = sld [smem:[#allocation11_spill]] }
 0x183   : > { %s1172_s30 = sld [smem:[#allocation7_spill]]  ;;  %s1176_s27 = smov %s812_s28 }
 0x184   : > { %s1173_s9 = sld [smem:[#allocation8_spill]]  ;;  %20 = sbr.rel (!%p18_p5) target bundleno = 5 (0x5), region = 98 }
 0x185   : > { %s1174_s10 = sld [smem:[#allocation9_spill]] }
 0x186   : > { %s1175_s11 = sld [smem:[#allocation10_spill]] }
 0x187   : > { %s1177_s28 = smov %s1170_s14 }
 0x189   :  { %557 = vsyncpa [#allocation4], 1 }
 0x18a   :  { %559 = vsyncpa [#allocation4 + $0x1], 1 }

</bundles_post_ra>
